<compile_context>
chip_gen: v5e
topology: v5e:2x2
jax: 0.10.0
libtpu: 0.0.40
codegen_flags: <defaults>
</compile_context>

<pallas_src>
import jax
import jax.numpy as jnp
from jax.experimental import pallas as pl
from jax.experimental.pallas import tpu as pltpu


# ---------------------------------------------------------------------------
# Kernel
# ---------------------------------------------------------------------------
def proxy_net1d_kernel(x_ref, w1_ref, gamma_ref, beta_ref, w2_ref, b2_ref, o_ref):
    # fc1 on the MXU: x (f32) cast to bf16 in-kernel, f32 accumulation.
    # (b1 omitted: a constant per-feature bias is exactly cancelled by the
    #  training-mode BatchNorm mean subtraction that follows.)
    h = jnp.dot(x_ref[...].astype(jnp.bfloat16), w1_ref[...],
                preferred_element_type=jnp.float32)                 # (B, D) f32

    # Training-mode BatchNorm1d, single-pass batch statistics in f32, folded
    # into one per-feature scale/shift so only 2 (B,D)-wide VPU passes remain.
    inv_b = 1.0 / h.shape[0]
    mean = jnp.sum(h, axis=0, keepdims=True) * inv_b                # E[h]   (1, D)
    ex2 = jnp.sum(h * h, axis=0, keepdims=True) * inv_b             # E[h^2] (1, D)
    var = jnp.maximum(ex2 - mean * mean, 0.0)                       # biased var
    scale = gamma_ref[...] * jax.lax.rsqrt(var + 1e-5)              # (1, D)
    shift = beta_ref[...] - mean * scale                            # (1, D)
    h = h * scale + shift

    # LeakyReLU(0.1) (mul+max, no select mask) fused with the bf16 downcast.
    h_bf = jnp.maximum(h, 0.1 * h).astype(jnp.bfloat16)             # (B, D) bf16

    # fc2 on the MXU: lane-dense padded N (=128), unmasked output store.
    out = jnp.dot(h_bf, w2_ref[...],
                  preferred_element_type=jnp.float32) + b2_ref[...]
    o_ref[...] = out


# ---------------------------------------------------------------------------
# One-time parameter preparation (keep OFF the per-call hot path)
# ---------------------------------------------------------------------------
def prepare_params(w1, b1, gamma, beta, w2, b2):
    """Cast / pad / reshape parameters once.

    w1: (D, D)  fc1 weight, stored transposed as (in, out)
    b1: (D,)    fc1 bias -- mathematically cancelled by training-mode BN (unused)
    gamma, beta: (D,) BatchNorm affine parameters
    w2: (D, C)  fc2 weight, stored transposed as (in, out)
    b2: (C,)    fc2 bias
    """
    del b1  # exactly cancelled by BN's batch-mean subtraction (training mode)
    D = w1.shape[0]
    C = w2.shape[1]
    C_pad = ((C + 127) // 128) * 128  # lane-dense fc2 / output width
    return dict(
        w1_bf=w1.astype(jnp.bfloat16),
        gamma=gamma.reshape(1, D).astype(jnp.float32),
        beta=beta.reshape(1, D).astype(jnp.float32),
        w2_pad=jnp.zeros((D, C_pad), jnp.bfloat16).at[:, :C].set(
            w2.astype(jnp.bfloat16)),
        b2_pad=jnp.zeros((1, C_pad), jnp.float32).at[:, :C].set(
            b2.astype(jnp.float32)),
        num_classes=C,
    )


# ---------------------------------------------------------------------------
# Forward wrapper
# ---------------------------------------------------------------------------
def proxy_net1d(x, params):
    """Forward of ProxyNet1D (training-mode BatchNorm).

    Returns the lane-dense padded output of shape (B, C_pad); the valid logits
    are out[:, :params['num_classes']].  Slicing is left to the consumer so
    this microsecond-scale call carries no extra HBM copy.

    The whole batch is one VMEM block on purpose: training-mode BatchNorm
    needs whole-batch statistics, so splitting the batch across grid steps
    would change the semantics.  At the sizes used here everything fits in
    VMEM with large margin.
    # TODO(synk): for much larger B/D (esp. v7x 64 MiB VMEM), tile fc1+BN over
    # D-feature blocks (exact, since BN stats are per-feature) and make fc2 a
    # K-accumulating "arbitrary" grid axis with an f32 VMEM accumulator.
    """
    B, D = x.shape
    C_pad = params["w2_pad"].shape[1]

    cost = pl.CostEstimate(
        flops=2 * B * D * (D + C_pad),
        transcendentals=D,  # rsqrt over the (1, D) variance row
        bytes_accessed=(x.size * 4
                        + params["w1_bf"].size * 2
                        + params["w2_pad"].size * 2
                        + 2 * D * 4 + C_pad * 4
                        + B * C_pad * 4),
    )

    vmem = pl.BlockSpec(memory_space=pltpu.MemorySpace.VMEM)
    return pl.pallas_call(
        proxy_net1d_kernel,
        out_shape=jax.ShapeDtypeStruct((B, C_pad), jnp.float32),
        in_specs=[vmem] * 6,
        out_specs=vmem,
        cost_estimate=cost,
    )(x, params["w1_bf"], params["gamma"], params["beta"],
      params["w2_pad"], params["b2_pad"])


# ---------------------------------------------------------------------------
# References
# ---------------------------------------------------------------------------
def proxy_net1d_ref_f32(x, w1, b1, gamma, beta, w2, b2):
    """Pure-JAX f32 reference with full PyTorch semantics (incl. b1, BN training)."""
    h = x @ w1 + b1
    mean = jnp.mean(h, axis=0, keepdims=True)
    var = jnp.mean((h - mean) ** 2, axis=0, keepdims=True)
    h = (h - mean) / jnp.sqrt(var + 1e-5) * gamma + beta
    h = jnp.where(h >= 0, h, 0.1 * h)
    return h @ w2 + b2


def proxy_net1d_ref_bf16(x, w1, gamma, beta, w2, b2):
    """Pure-JAX reference matching the kernel's bf16-matmul / f32-BN numerics."""
    h = jnp.dot(x.astype(jnp.bfloat16), w1.astype(jnp.bfloat16),
                preferred_element_type=jnp.float32)
    inv_b = 1.0 / h.shape[0]
    mean = jnp.sum(h, axis=0, keepdims=True) * inv_b
    ex2 = jnp.sum(h * h, axis=0, keepdims=True) * inv_b
    var = jnp.maximum(ex2 - mean * mean, 0.0)
    scale = gamma * jax.lax.rsqrt(var + 1e-5)
    shift = beta - mean * scale
    h = h * scale + shift
    h = jnp.maximum(h, 0.1 * h).astype(jnp.bfloat16)
    return jnp.dot(h, w2.astype(jnp.bfloat16),
                   preferred_element_type=jnp.float32) + b2


def init_params(key, input_dim=256, num_classes=28):
    """Deterministic init matching the PyTorch __init__:
       Linear weights ~ kaiming_normal_(mode='fan_out', nonlinearity='relu')
       => std = sqrt(2 / fan_out); biases = 0; BN gamma = 1, beta = 0."""
    k1, k2 = jax.random.split(key)
    # PyTorch Linear weight is (out, in); fan_out = out_features.
    std1 = (2.0 / input_dim) ** 0.5
    std2 = (2.0 / num_classes) ** 0.5
    w1_pt = std1 * jax.random.normal(k1, (input_dim, input_dim), jnp.float32)
    w2_pt = std2 * jax.random.normal(k2, (num_classes, input_dim), jnp.float32)
    return dict(
        w1=w1_pt.T,                                   # (in, out) for the kernel
        b1=jnp.zeros((input_dim,), jnp.float32),
        gamma=jnp.ones((input_dim,), jnp.float32),
        beta=jnp.zeros((input_dim,), jnp.float32),
        w2=w2_pt.T,                                   # (in, out)
        b2=jnp.zeros((num_classes,), jnp.float32),
    )


if __name__ == "__main__":
    key = jax.random.PRNGKey(0)
    kx, kp = jax.random.split(key)

    batch, input_dim, num_classes = 32, 256, 28
    x = jax.random.normal(kx, (batch, input_dim), jnp.float32)
    raw = init_params(kp, input_dim=input_dim, num_classes=num_classes)

    # One-time parameter prep (cast / pad) -- off the per-call hot path.
    params = prepare_params(raw["w1"], raw["b1"], raw["gamma"], raw["beta"],
                            raw["w2"], raw["b2"])

    out_pad = proxy_net1d(x, params)
    out_pad = jax.block_until_ready(out_pad)
    assert out_pad.shape == (batch, ((num_classes + 127) // 128) * 128)

    out = out_pad[:, :num_classes]  # consumer-side slice (off the hot path)
    assert out.shape == (batch, num_classes)

    # Tight check against a reference using the same bf16-matmul numerics.
    ref_bf = proxy_net1d_ref_bf16(
        x, raw["w1"], raw["gamma"].reshape(1, -1), raw["beta"].reshape(1, -1),
        raw["w2"], raw["b2"].reshape(1, -1))
    assert jnp.allclose(out, ref_bf, atol=5e-3, rtol=5e-3), \
        "mismatch vs bf16-matched reference"

    # Looser check against the full-f32 PyTorch-semantics reference
    # (tolerance reflects bf16 matmul inputs).
    ref_f32 = proxy_net1d_ref_f32(x, raw["w1"], raw["b1"], raw["gamma"],
                                  raw["beta"], raw["w2"], raw["b2"])
    assert jnp.allclose(out, ref_f32, atol=0.3, rtol=0.05), \
        "mismatch vs f32 reference"

    # Padded lanes beyond num_classes must be exactly zero-weight + zero-bias.
    assert jnp.allclose(out_pad[:, num_classes:], 0.0, atol=1e-5)

    print("KERNEL_OK")
</pallas_src>

<mosaic_0001>
module attributes {stable_mosaic.version = 11 : i64} {
  func.func @proxy_net1d_kernel(%arg0: memref<32x256xf32, #tpu.memory_space<vmem>>, %arg1: memref<256x256xbf16, #tpu.memory_space<vmem>>, %arg2: memref<1x256xf32, #tpu.memory_space<vmem>>, %arg3: memref<1x256xf32, #tpu.memory_space<vmem>>, %arg4: memref<256x128xbf16, #tpu.memory_space<vmem>>, %arg5: memref<1x128xf32, #tpu.memory_space<vmem>>, %arg6: memref<32x128xf32, #tpu.memory_space<vmem>>) attributes {dimension_semantics = [], scalar_prefetch = 0 : i64, scratch_operands = 0 : i64, tpu.core_type = #tpu.core_type<tc>} {
    %c0 = arith.constant 0 : index
    %c0_0 = arith.constant 0 : index
    %0 = vector.load %arg0[%c0, %c0_0] : memref<32x256xf32, #tpu.memory_space<vmem>>, vector<32x256xf32>
    %1 = arith.truncf %0 : vector<32x256xf32> to vector<32x256xbf16>
    %c0_1 = arith.constant 0 : index
    %c0_2 = arith.constant 0 : index
    %2 = vector.load %arg1[%c0_1, %c0_2] : memref<256x256xbf16, #tpu.memory_space<vmem>>, vector<256x256xbf16>
    %cst = arith.constant dense<0.000000e+00> : vector<32x256xf32>
    %3 = tpu.matmul %1, %2, %cst {dimension_numbers = #tpu.dot_dimension_numbers<[1], [0], [0], [1], [0, 0, 1, 1], [], []>} : vector<32x256xbf16>, vector<256x256xbf16>, vector<32x256xf32> -> vector<32x256xf32>
    %cst_3 = arith.constant dense<0.000000e+00> : vector<256xf32>
    %4 = vector.multi_reduction <add>, %3, %cst_3 [0] : vector<32x256xf32> to vector<256xf32>
    %5 = vector.shape_cast %4 : vector<256xf32> to vector<1x256xf32>
    %cst_4 = arith.constant 3.125000e-02 : f32
    %6 = vector.broadcast %cst_4 : f32 to vector<1x256xf32>
    %7 = arith.mulf %5, %6 : vector<1x256xf32>
    %8 = arith.mulf %3, %3 : vector<32x256xf32>
    %cst_5 = arith.constant dense<0.000000e+00> : vector<256xf32>
    %9 = vector.multi_reduction <add>, %8, %cst_5 [0] : vector<32x256xf32> to vector<256xf32>
    %10 = vector.shape_cast %9 : vector<256xf32> to vector<1x256xf32>
    %cst_6 = arith.constant 3.125000e-02 : f32
    %11 = vector.broadcast %cst_6 : f32 to vector<1x256xf32>
    %12 = arith.mulf %10, %11 : vector<1x256xf32>
    %13 = arith.mulf %7, %7 : vector<1x256xf32>
    %14 = arith.subf %12, %13 : vector<1x256xf32>
    %cst_7 = arith.constant 0.000000e+00 : f32
    %15 = vector.broadcast %cst_7 : f32 to vector<1x256xf32>
    %16 = arith.maximumf %14, %15 : vector<1x256xf32>
    %c0_8 = arith.constant 0 : index
    %c0_9 = arith.constant 0 : index
    %17 = vector.load %arg2[%c0_8, %c0_9] : memref<1x256xf32, #tpu.memory_space<vmem>>, vector<1x256xf32>
    %cst_10 = arith.constant 9.99999974E-6 : f32
    %18 = vector.broadcast %cst_10 : f32 to vector<1x256xf32>
    %19 = arith.addf %16, %18 : vector<1x256xf32>
    %20 = math.rsqrt %19 : vector<1x256xf32>
    %21 = arith.mulf %17, %20 : vector<1x256xf32>
    %c0_11 = arith.constant 0 : index
    %c0_12 = arith.constant 0 : index
    %22 = vector.load %arg3[%c0_11, %c0_12] : memref<1x256xf32, #tpu.memory_space<vmem>>, vector<1x256xf32>
    %23 = arith.mulf %7, %21 : vector<1x256xf32>
    %24 = arith.subf %22, %23 : vector<1x256xf32>
    %25 = vector.broadcast %21 : vector<1x256xf32> to vector<32x256xf32>
    %26 = arith.mulf %3, %25 : vector<32x256xf32>
    %27 = vector.broadcast %24 : vector<1x256xf32> to vector<32x256xf32>
    %28 = arith.addf %26, %27 : vector<32x256xf32>
    %cst_13 = arith.constant 1.000000e-01 : f32
    %29 = vector.broadcast %cst_13 : f32 to vector<32x256xf32>
    %30 = arith.mulf %29, %28 : vector<32x256xf32>
    %31 = arith.maximumf %28, %30 : vector<32x256xf32>
    %32 = arith.truncf %31 : vector<32x256xf32> to vector<32x256xbf16>
    %c0_14 = arith.constant 0 : index
    %c0_15 = arith.constant 0 : index
    %33 = vector.load %arg4[%c0_14, %c0_15] : memref<256x128xbf16, #tpu.memory_space<vmem>>, vector<256x128xbf16>
    %cst_16 = arith.constant dense<0.000000e+00> : vector<32x128xf32>
    %34 = tpu.matmul %32, %33, %cst_16 {dimension_numbers = #tpu.dot_dimension_numbers<[1], [0], [0], [1], [0, 0, 1, 1], [], []>} : vector<32x256xbf16>, vector<256x128xbf16>, vector<32x128xf32> -> vector<32x128xf32>
    %c0_17 = arith.constant 0 : index
    %c0_18 = arith.constant 0 : index
    %35 = vector.load %arg5[%c0_17, %c0_18] : memref<1x128xf32, #tpu.memory_space<vmem>>, vector<1x128xf32>
    %36 = vector.broadcast %35 : vector<1x128xf32> to vector<32x128xf32>
    %37 = arith.addf %34, %36 : vector<32x128xf32>
    %c0_19 = arith.constant 0 : index
    %c0_20 = arith.constant 0 : index
    %38 = vector.load %arg6[%c0_19, %c0_20] : memref<32x128xf32, #tpu.memory_space<vmem>>, vector<32x128xf32>
    tpu.vector_store %arg6[%c0_19, %c0_20], %37 {strides = array<i32>} : memref<32x128xf32, #tpu.memory_space<vmem>>, vector<32x128xf32>,
    return
  }
}

</mosaic_0001>

<bundles_post_ra>
// kernel: tpu_custom_call.1
= control target key start
LH: loop header
LB: loop body
LE: loop exit
PB: predicated region body
PF: predicated region fallthrough
CT: control target
= control target key end

     0   :  { %11 = vsyncpa [#allocation3], 0  ;;  %s1230_s0 = inlined_call_operand.hbm [shape: f32[32,256], index: 0, kind: input, shape index: {}]   ;;  %s1231_s1 = inlined_call_operand.hbm [shape: bf16[256,256], index: 1, kind: input, shape index: {}]   ;;  %s1232_s2 = inlined_call_operand.hbm [shape: f32[1,256], index: 2, kind: input, shape index: {}]   ;;  %s1233_s3 = inlined_call_operand.vmem [shape: f32[1,256], index: 3, kind: input, shape index: {}]   ;;  %s1234_s4 = inlined_call_operand.hbm [shape: bf16[256,128], index: 4, kind: input, shape index: {}]   ;;  %s1235_s5 = inlined_call_operand.vmem [shape: f32[1,128], index: 5, kind: input, shape index: {}]   ;;  %s1236_s6 = inlined_call_operand.hbm [shape: f32[32,128], index: 6, kind: output, shape index: {}]  }
   0x1   :  { %12 = vsyncpa [#allocation6], 0 }
   0x2   :  { %13 = vsyncpa [#allocation9], 0  ;;  %s32_s23 = sshll.u32 %s1231_s1, 4  ;;  %s33_s23 = int_to_ptr.hbm [resolvable:$true] %s32_s23 }
   0x3   :  { %14 = vsyncpa [#allocation4], 0  ;;  %s1099_s24 = smov [#allocation5]   ;;  %s19_s28 = sshll.u32 %s1230_s0, 4  ;;  %s20_s28 = int_to_ptr.hbm [resolvable:$true] %s19_s28 }
   0x4   :  { %s34_s25 = sshll.u32 %s1099_s24, 4  ;;  %s1100_s29 = smov 128   ;;  %s35_s25 = int_to_ptr.vmem [resolvable:$true] %s34_s25 }
   0x5   :  { %s1101_s30 = smov 8   ;;  %s1102_s7 = smov [#allocation2]  }
   0x6   :  { %40 = dma.hbm_to_vmem [thread:$0]  %s33_s23, 4096, %s35_s25, [#allocation6], %s1100_s29, %s1100_s29, %s1101_s30  }
   0x7   :  { %s21_s8 = sshll.u32 %s1102_s7, 4  ;;  %s1103_s1 = smov 256   ;;  %s22_s8 = int_to_ptr.vmem [resolvable:$true] %s21_s8 }
   0x8   :  { %s1104_s9 = smov 16   ;;  %s46_s12 = sshll.u32 %s1232_s2, 4  ;;  %s47_s12 = int_to_ptr.hbm [resolvable:$true] %s46_s12 }
   0x9   :  { %27 = dma.hbm_to_vmem [thread:$0]  %s20_s28, 1024, %s22_s8, [#allocation3], %s1103_s1, %s1103_s1, %s1104_s9  }
   0xa   :  { %s1105_s13 = smov [#allocation7]   ;;  %s58_s16 = sshll.u32 %s1234_s4, 4  ;;  %s59_s16 = int_to_ptr.hbm [resolvable:$true] %s58_s16 }
   0xb   :  { %s48_s0 = sshll.u32 %s1105_s13, 4  ;;  %s1106_s17 = smov [#allocation8]   ;;  %s49_s0 = int_to_ptr.vmem [resolvable:$true] %s48_s0 }
   0xc   :  { %51 = dma.hbm_to_vmem [thread:$0]  %s47_s12, 32, %s49_s0, [#allocation6]  }
   0xd   :  { %s60_s18 = sshll.u32 %s1106_s17, 4  ;;  %s1107_s19 = smov 64   ;;  %s61_s18 = int_to_ptr.vmem [resolvable:$true] %s60_s18 }
   0xe   :  { %s1108_s20 = smov 4  }
   0xf   :  { %66 = dma.hbm_to_vmem [thread:$0]  %s59_s16, 2048, %s61_s18, [#allocation9], %s1107_s19, %s1107_s19, %s1108_s20  }
  0x10   :  { %1091 = dma.done.wait [#allocation3], 1024  }
  0x11   :  { %1092 = vsyncadd [#allocation3], 4294966272 }
  0x12   :  { %1093 = dma.done.wait [#allocation6], 4128  }
  0x13   :  { %1094 = vsyncadd [#allocation6], 4294963168 }
  0x14   :  { %1095 = dma.done.wait [#allocation9], 2048  }
  0x15   :  { %1096 = vsyncadd [#allocation9], 4294965248  ;;  %v757_v0 = vld [vmem:[#allocation5 + $0x70] sm:$0xf]  ;;  %v906_v1 = vld [vmem:[#allocation5 + $0x74] sm:$0xf0] }
  0x16   :  { %v821_v2 = vld [vmem:[#allocation5 + $0xf0] sm:$0xf]  ;;  %v758_v3 = vor.u32 %v906_v1, %v757_v0  ;;  %v922_v4 = vld [vmem:[#allocation5 + $0xf4] sm:$0xf0]  ;;  %v905_v5 = vld [vmem:[#allocation5 + $0x74] sm:$0xf] }
  0x17   :  { %v759_v6 = vld [vmem:[#allocation5 + $0x78] sm:$0xf0]  ;;  %v822_v7 = vor.u32 %v922_v4, %v821_v2  ;;  %v921_v9 = vld [vmem:[#allocation5 + $0xf4] sm:$0xf]  ;;  %v749_v11 = vld [vmem:[#allocation5 + $0x60] sm:$0xf] }
  0x18   :  { %v762_v8 = vor.u32 %v905_v5, %v759_v6  ;;  %v823_v10 = vld [vmem:[#allocation5 + $0xf8] sm:$0xf0]  ;;  %289 = vmatpush.bf16.msra.mxu0 %v758_v3  ;;  %v904_v13 = vld [vmem:[#allocation5 + $0x64] sm:$0xf0]  ;;  %v813_v14 = vld [vmem:[#allocation5 + $0xe0] sm:$0xf] }
  0x19   :  { %v826_v12 = vor.u32 %v921_v9, %v823_v10  ;;  %v920_v15 = vld [vmem:[#allocation5 + $0xe4] sm:$0xf0]  ;;  %308 = vmatpush.bf16.msra.mxu1 %v822_v7  ;;  %v750_v16 = vor.u32 %v904_v13, %v749_v11  ;;  %v903_v18 = vld [vmem:[#allocation5 + $0x64] sm:$0xf]  ;;  %v751_v19 = vld [vmem:[#allocation5 + $0x68] sm:$0xf0] }
  0x1a   :  { %327 = vmatpush.bf16.msra.mxu2 %v762_v8  ;;  %v814_v17 = vor.u32 %v920_v15, %v813_v14  ;;  %v919_v20 = vld [vmem:[#allocation5 + $0xe4] sm:$0xf]  ;;  %v754_v21 = vor.u32 %v903_v18, %v751_v19  ;;  %v815_v22 = vld [vmem:[#allocation5 + $0xe8] sm:$0xf0]  ;;  %v741_v23 = vld [vmem:[#allocation5 + $0x50] sm:$0xf] }
  0x1b   :  { %346 = vmatpush.bf16.msra.mxu3 %v826_v12  ;;  %v902_v24 = vld [vmem:[#allocation5 + $0x54] sm:$0xf0]  ;;  %v818_v25 = vor.u32 %v919_v20, %v815_v22  ;;  %v805_v26 = vld [vmem:[#allocation5 + $0xd0] sm:$0xf]  ;;  %v901_v28 = vld [vmem:[#allocation5 + $0x54] sm:$0xf] }
  0x1c   :  { %v918_v27 = vld [vmem:[#allocation5 + $0xd4] sm:$0xf0]  ;;  %290 = vmatpush.bf16.msra.mxu0 %v750_v16  ;;  %v742_v29 = vor.u32 %v902_v24, %v741_v23  ;;  %v743_v30 = vld [vmem:[#allocation5 + $0x58] sm:$0xf0]  ;;  %v917_v31 = vld [vmem:[#allocation5 + $0xd4] sm:$0xf] }
  0x1d   :  { %v807_v32 = vld [vmem:[#allocation5 + $0xd8] sm:$0xf0]  ;;  %309 = vmatpush.bf16.msra.mxu1 %v814_v17  ;;  %v806_v33 = vor.u32 %v918_v27, %v805_v26  ;;  %v746_v34 = vor.u32 %v901_v28, %v743_v30  ;;  %v733_v35 = vld [vmem:[#allocation5 + $0x40] sm:$0xf]  ;;  %v900_v36 = vld [vmem:[#allocation5 + $0x44] sm:$0xf0] }
  0x1e   :  { %328 = vmatpush.bf16.msra.mxu2 %v754_v21  ;;  %v797_v37 = vld [vmem:[#allocation5 + $0xc0] sm:$0xf]  ;;  %v810_v38 = vor.u32 %v917_v31, %v807_v32  ;;  %v916_v39 = vld [vmem:[#allocation5 + $0xc4] sm:$0xf0]  ;;  %v899_v40 = vld [vmem:[#allocation5 + $0x44] sm:$0xf]  ;;  %v734_v44 = vor.u32 %v900_v36, %v733_v35 }
  0x1f   :  { %347 = vmatpush.bf16.msra.mxu3 %v818_v25  ;;  %v735_v41 = vld [vmem:[#allocation5 + $0x48] sm:$0xf0]  ;;  %v915_v42 = vld [vmem:[#allocation5 + $0xc4] sm:$0xf]  ;;  %v798_v45 = vor.u32 %v916_v39, %v797_v37  ;;  %v725_v47 = vld [vmem:[#allocation5 + $0x30] sm:$0xf] }
  0x20   :  { %v799_v43 = vld [vmem:[#allocation5 + $0xc8] sm:$0xf0]  ;;  %291 = vmatpush.bf16.msra.mxu0 %v742_v29  ;;  %v738_v46 = vor.u32 %v899_v40, %v735_v41  ;;  %v898_v48 = vld [vmem:[#allocation5 + $0x34] sm:$0xf0]  ;;  %v789_v49 = vld [vmem:[#allocation5 + $0xb0] sm:$0xf] }
  0x21   :  { %310 = vmatpush.bf16.msra.mxu1 %v806_v33  ;;  %v802_v50 = vor.u32 %v915_v42, %v799_v43  ;;  %v914_v51 = vld [vmem:[#allocation5 + $0xb4] sm:$0xf0]  ;;  %v897_v52 = vld [vmem:[#allocation5 + $0x34] sm:$0xf]  ;;  %v727_v53 = vld [vmem:[#allocation5 + $0x38] sm:$0xf0]  ;;  %v726_v56 = vor.u32 %v898_v48, %v725_v47 }
  0x22   :  { %329 = vmatpush.bf16.msra.mxu2 %v746_v34  ;;  %v913_v54 = vld [vmem:[#allocation5 + $0xb4] sm:$0xf]  ;;  %v791_v55 = vld [vmem:[#allocation5 + $0xb8] sm:$0xf0]  ;;  %v790_v57 = vor.u32 %v914_v51, %v789_v49  ;;  %v730_v58 = vor.u32 %v897_v52, %v727_v53  ;;  %v717_v59 = vld [vmem:[#allocation5 + $0x20] sm:$0xf] }
  0x23   :  { %348 = vmatpush.bf16.msra.mxu3 %v810_v38  ;;  %v896_v60 = vld [vmem:[#allocation5 + $0x24] sm:$0xf0]  ;;  %v781_v61 = vld [vmem:[#allocation5 + $0xa0] sm:$0xf]  ;;  %v794_v62 = vor.u32 %v913_v54, %v791_v55  ;;  %v895_v0 = vld [vmem:[#allocation5 + $0x24] sm:$0xf] }
  0x24   :  { %292 = vmatpush.bf16.msra.mxu0 %v734_v44  ;;  %v912_v63 = vld [vmem:[#allocation5 + $0xa4] sm:$0xf0]  ;;  %v719_v1 = vld [vmem:[#allocation5 + $0x28] sm:$0xf0]  ;;  %v911_v2 = vld [vmem:[#allocation5 + $0xa4] sm:$0xf]  ;;  %v718_v4 = vor.u32 %v896_v60, %v717_v59 }
  0x25   :  { %311 = vmatpush.bf16.msra.mxu1 %v798_v45  ;;  %v783_v3 = vld [vmem:[#allocation5 + $0xa8] sm:$0xf0]  ;;  %v782_v5 = vor.u32 %v912_v63, %v781_v61  ;;  %v722_v6 = vor.u32 %v895_v0, %v719_v1  ;;  %v709_v7 = vld [vmem:[#allocation5 + $0x10] sm:$0xf]  ;;  %v894_v8 = vld [vmem:[#allocation5 + $0x14] sm:$0xf0] }
  0x26   :  { %330 = vmatpush.bf16.msra.mxu2 %v738_v46  ;;  %v773_v9 = vld [vmem:[#allocation5 + $0x90] sm:$0xf]  ;;  %v786_v10 = vor.u32 %v911_v2, %v783_v3  ;;  %v910_v11 = vld [vmem:[#allocation5 + $0x94] sm:$0xf0]  ;;  %v893_v12 = vld [vmem:[#allocation5 + $0x14] sm:$0xf]  ;;  %v710_v16 = vor.u32 %v894_v8, %v709_v7 }
  0x27   :  { %349 = vmatpush.bf16.msra.mxu3 %v802_v50  ;;  %v711_v13 = vld [vmem:[#allocation5 + $0x18] sm:$0xf0]  ;;  %v909_v14 = vld [vmem:[#allocation5 + $0x94] sm:$0xf]  ;;  %v701_v17 = vld [vmem:[#allocation5] sm:$0xf]  ;;  %v774_v18 = vor.u32 %v910_v11, %v773_v9 }
  0x28   :  { %293 = vmatpush.bf16.msra.mxu0 %v726_v56  ;;  %v775_v15 = vld [vmem:[#allocation5 + $0x98] sm:$0xf0]  ;;  %v714_v19 = vor.u32 %v893_v12, %v711_v13  ;;  %v892_v20 = vld [vmem:[#allocation5 + $0x4] sm:$0xf0]  ;;  %v765_v21 = vld [vmem:[#allocation5 + $0x80] sm:$0xf] }
  0x29   :  { %312 = vmatpush.bf16.msra.mxu1 %v790_v57  ;;  %v778_v22 = vor.u32 %v909_v14, %v775_v15  ;;  %v908_v23 = vld [vmem:[#allocation5 + $0x84] sm:$0xf0]  ;;  %v891_v24 = vld [vmem:[#allocation5 + $0x4] sm:$0xf]  ;;  %v703_v25 = vld [vmem:[#allocation5 + $0x8] sm:$0xf0]  ;;  %v702_v28 = vor.u32 %v892_v20, %v701_v17 }
  0x2a   :  { %331 = vmatpush.bf16.msra.mxu2 %v730_v58  ;;  %v907_v26 = vld [vmem:[#allocation5 + $0x84] sm:$0xf]  ;;  %v767_v27 = vld [vmem:[#allocation5 + $0x88] sm:$0xf0]  ;;  %v87_v30 = vld [vmem:[#allocation2 + $0x10] sm:$0xff]  ;;  %v766_v31 = vor.u32 %v908_v23, %v765_v21  ;;  %v706_v32 = vor.u32 %v891_v24, %v703_v25  ;;  %vm445_vm5 = vcmask 1040384  }
  0x2b   :  { %350 = vmatpush.bf16.msra.mxu3 %v794_v62  ;;  %v85_v29 = vld [vmem:[#allocation2] sm:$0xff]  ;;  %v86_v33 = vld [vmem:[#allocation2 + $0x8] sm:$0xff]  ;;  %v88_v34 = vld [vmem:[#allocation2 + $0x18] sm:$0xff]  ;;  %v770_v35 = vor.u32 %v907_v26, %v767_v27  ;;  %s1109_s22 = smov [#allocation10]   ;;  %s684_s25 = sshll.u32 %s1236_s6, 4  ;;  %s685_s25 = int_to_ptr.hbm [resolvable:$true] %s684_s25 }
  0x2c   :  { %294 = vmatpush.bf16.msra.mxu0 %v718_v4  ;;  %v93_v36 = vpack.c.bf16 %v87_v30, %v85_v29  ;;  %v94_v37 = vpack.c.bf16 %v88_v34, %v86_v33  ;;  %v89_v38 = vld [vmem:[#allocation2 + $0x20] sm:$0xff]  ;;  %v91_v39 = vld [vmem:[#allocation2 + $0x30] sm:$0xff]  ;;  %v90_v40 = vld [vmem:[#allocation2 + $0x28] sm:$0xff]  ;;  %s682_s23 = sshll.u32 %s1109_s22, 4  ;;  %s683_s23 = int_to_ptr.vmem [resolvable:$true] %s682_s23 }
  0x2d   :  { %313 = vmatpush.bf16.msra.mxu1 %v782_v5  ;;  %v92_v41 = vld [vmem:[#allocation2 + $0x38] sm:$0xff]  ;;  %v95_v42 = vpack.c.bf16 %v91_v39, %v89_v38 }
  0x2e   :  { %332 = vmatpush.bf16.msra.mxu2 %v722_v6  ;;  %v96_v43 = vpack.c.bf16 %v92_v41, %v90_v40  ;;  %v930_v30 = vld [vmem:[#allocation8 + $0x38] sm:$0xff]  ;;  %v929_v40 = vld [vmem:[#allocation8 + $0x30] sm:$0xff] }
  0x2f   :  { %351 = vmatpush.bf16.msra.mxu3 %v786_v10  ;;  %v937_v41 = vld [vmem:[#allocation8 + $0x70] sm:$0xff] }
  0x30   :  { %295 = vmatpush.bf16.msra.mxu0 %v710_v16 }
  0x31   :  { %314 = vmatpush.bf16.msra.mxu1 %v774_v18 }
  0x32   :  { %333 = vmatpush.bf16.msra.mxu2 %v714_v19 }
  0x33   :  { %352 = vmatpush.bf16.msra.mxu3 %v778_v22 }
  0x34   :  { %296 = vmatpush.bf16.msra.mxu0 %v702_v28 }
  0x35   :  { %315 = vmatpush.bf16.msra.mxu1 %v766_v31  ;;  %v938_v31 = vld [vmem:[#allocation8 + $0x78] sm:$0xff] }
  0x36   :  { %334 = vmatpush.bf16.msra.mxu2 %v706_v32 }
  0x37   :  { %353 = vmatpush.bf16.msra.mxu3 %v770_v35  ;;  %297 = vmatmul.bf16.vlgmr.msra.gmra.mxu0 %v93_v36 }
  0x38   :  { %316 = vmatmul.bf16.vlgmr.msra.gmra.mxu1 %v94_v37  ;;  %636 = vmatpush.bf16.msrb.mxu0 %v930_v30 }
  0x39   :  { %335 = vmatmul.bf16.vlgmr.msra.gmra.mxu2 %v93_v36  ;;  %655 = vmatpush.bf16.msrb.mxu1 %v938_v31 }
  0x3a   :  { %354 = vmatmul.bf16.vlgmr.msra.gmra.mxu3 %v94_v37  ;;  %939 = vmatpush.bf16.msrb.mxu2 %v930_v30 }
  0x3b   :  { %947 = vmatpush.bf16.msrb.mxu3 %v938_v31 }
  0x3c   :  { %637 = vmatpush.bf16.msrb.mxu0 %v929_v40 }
  0x3d   :  { %656 = vmatpush.bf16.msrb.mxu1 %v937_v41 }
  0x3e   :  { %940 = vmatpush.bf16.msrb.mxu2 %v929_v40 }
  0x3f   :  { %948 = vmatpush.bf16.msrb.mxu3 %v937_v41  ;;  %v449_v41 = vld [vmem:[%s1233_s3] sm:$0x3] }
  0x47   :  { %302 = vmatmul.bf16.gmra.mxu0 %v95_v42 }
  0x48   :  { %321 = vmatmul.bf16.gmra.mxu1 %v96_v43 }
  0x49   :  { %340 = vmatmul.bf16.gmra.mxu2 %v95_v42 }
  0x4a   :  { %359 = vmatmul.bf16.gmra.mxu3 %v96_v43 }
  0xb4   :  { %v298_v44 = vpop.f32.mrf.mxu0 }
  0xb5   :  { %v317_v45 = vpop.f32.mrf.mxu1 }
  0xb6   :  { %v1160_v54 = vadd.f32 %v317_v45, %v298_v44 }
  0xb8   :  { %v385_v57 = vmul.f32 %v1160_v54, %v1160_v54 }
  0xbc   :  { %v336_v46 = vpop.f32.mrf.mxu2  ;;  %v300_v48 = vpop.f32.mrf.mxu0 }
  0xbd   :  { %v355_v47 = vpop.f32.mrf.mxu3  ;;  %v319_v49 = vpop.f32.mrf.mxu1 }
  0xbe   :  { %v1162_v55 = vadd.f32 %v319_v49, %v300_v48  ;;  %v1179_v5 = vadd.f32 %v355_v47, %v336_v46 }
  0xc0   :  { %v387_v58 = vmul.f32 %v1162_v55, %v1162_v55  ;;  %v365_v60 = vadd.f32 %v1162_v55, %v1160_v54  ;;  %v386_v13 = vmul.f32 %v1179_v5, %v1179_v5 }
  0xc2   :  { %v393_v2 = vadd.f32 %v387_v58, %v385_v57 }
  0xc4   :  { %v338_v50 = vpop.f32.mrf.mxu2  ;;  %v303_v52 = vpop.f32.mrf.mxu0 }
  0xc5   :  { %v357_v51 = vpop.f32.mrf.mxu3  ;;  %v322_v53 = vpop.f32.mrf.mxu1 }
  0xc6   :  { %v1164_v56 = vadd.f32 %v322_v53, %v303_v52  ;;  %v1174_v0 = vadd.f32 %v357_v51, %v338_v50  ;;  %v928_v50 = vld [vmem:[#allocation8 + $0x28] sm:$0xff] }
  0xc7   :  { %v936_v51 = vld [vmem:[#allocation8 + $0x68] sm:$0xff]  ;;  %941 = vmatpush.bf16.msrb.mxu2 %v928_v50  ;;  %638 = vmatpush.bf16.msrb.mxu0 %v928_v50 }
  0xc8   :  { %v389_v61 = vmul.f32 %v1164_v56, %v1164_v56  ;;  %v366_v3 = vadd.f32 %v365_v60, %v1164_v56  ;;  %v388_v10 = vmul.f32 %v1174_v0, %v1174_v0  ;;  %v374_v14 = vadd.f32 %v1174_v0, %v1179_v5  ;;  %657 = vmatpush.bf16.msrb.mxu1 %v936_v51 }
  0xc9   :  { %949 = vmatpush.bf16.msrb.mxu3 %v936_v51 }
  0xca   :  { %v394_v7 = vadd.f32 %v393_v2, %v389_v61  ;;  %v402_v20 = vadd.f32 %v388_v10, %v386_v13  ;;  %v927_v61 = vld [vmem:[#allocation8 + $0x20] sm:$0xff]  ;;  %v933_v13 = vld [vmem:[#allocation8 + $0x50] sm:$0xff] }
  0xcb   :  { %942 = vmatpush.bf16.msrb.mxu2 %v927_v61  ;;  %639 = vmatpush.bf16.msrb.mxu0 %v927_v61 }
  0xcc   :  { %v341_v59 = vpop.f32.mrf.mxu2  ;;  %v305_v63 = vpop.f32.mrf.mxu0 }
  0xcd   :  { %v360_v62 = vpop.f32.mrf.mxu3  ;;  %v324_v1 = vpop.f32.mrf.mxu1 }
  0xce   :  { %v1177_v4 = vadd.f32 %v324_v1, %v305_v63  ;;  %v1181_v6 = vadd.f32 %v360_v62, %v341_v59  ;;  %v935_v62 = vld [vmem:[#allocation8 + $0x60] sm:$0xff] }
  0xcf   :  { %658 = vmatpush.bf16.msrb.mxu1 %v935_v62  ;;  %950 = vmatpush.bf16.msrb.mxu3 %v935_v62 }
  0xd0   :  { %v367_v8 = vadd.f32 %v366_v3, %v1177_v4  ;;  %v391_v9 = vmul.f32 %v1177_v4, %v1177_v4  ;;  %v390_v15 = vmul.f32 %v1181_v6, %v1181_v6  ;;  %v375_v21 = vadd.f32 %v374_v14, %v1181_v6 }
  0xd2   :  { %v368_v11 = vrot.slane %v367_v8, 4  ;;  %v395_v12 = vadd.f32 %v394_v7, %v391_v9  ;;  %v403_v25 = vadd.f32 %v402_v20, %v390_v15  ;;  %v934_v9 = vld [vmem:[#allocation8 + $0x58] sm:$0xff]  ;;  %v923_v20 = vld [vmem:[#allocation8] sm:$0xff] }
  0xd3   :  { %659 = vmatpush.bf16.msrb.mxu1 %v934_v9  ;;  %951 = vmatpush.bf16.msrb.mxu3 %v934_v9 }
  0xd4   :  { %v343_v16 = vpop.f32.mrf.mxu2  ;;  %v369_v17 = vadd.f32 %v368_v11, %v367_v8  ;;  %v396_v18 = vrot.slane %v395_v12, 4  ;;  %v926_v8 = vld [vmem:[#allocation8 + $0x18] sm:$0xff] }
  0xd5   :  { %v362_v19 = vpop.f32.mrf.mxu3  ;;  %943 = vmatpush.bf16.msrb.mxu2 %v926_v8  ;;  %640 = vmatpush.bf16.msrb.mxu0 %v926_v8 }
  0xd6   :  { %v1195_v22 = vadd.f32 %v362_v19, %v343_v16  ;;  %v370_v23 = vrot.slane %v369_v17, 2  ;;  %v397_v24 = vadd.f32 %v396_v18, %v395_v12  ;;  %v925_v12 = vld [vmem:[#allocation8 + $0x10] sm:$0xff]  ;;  %v932_v18 = vld [vmem:[#allocation8 + $0x48] sm:$0xff] }
  0xd7   :  { %660 = vmatpush.bf16.msrb.mxu1 %v933_v13  ;;  %952 = vmatpush.bf16.msrb.mxu3 %v933_v13 }
  0xd8   :  { %v376_v26 = vadd.f32 %v375_v21, %v1195_v22  ;;  %v392_v27 = vmul.f32 %v1195_v22, %v1195_v22  ;;  %v371_v28 = vadd.f32 %v370_v23, %v369_v17  ;;  %v398_v29 = vrot.slane %v397_v24, 2  ;;  %v924_v17 = vld [vmem:[#allocation8 + $0x8] sm:$0xff]  ;;  %v931_v21 = vld [vmem:[#allocation8 + $0x40] sm:$0xff] }
  0xd9   :  { %944 = vmatpush.bf16.msrb.mxu2 %v925_v12  ;;  %641 = vmatpush.bf16.msrb.mxu0 %v925_v12 }
  0xda   :  { %v377_v32 = vrot.slane %v376_v26, 4  ;;  %v404_v33 = vadd.f32 %v403_v25, %v392_v27  ;;  %v372_v34 = vrot.slane %v371_v28, 1  ;;  %v399_v35 = vadd.f32 %v398_v29, %v397_v24 }
  0xdb   :  { %661 = vmatpush.bf16.msrb.mxu1 %v932_v18  ;;  %953 = vmatpush.bf16.msrb.mxu3 %v932_v18 }
  0xdc   :  { %v378_v36 = vadd.f32 %v377_v32, %v376_v26  ;;  %v405_v37 = vrot.slane %v404_v33, 4  ;;  %v373_v38 = vadd.f32 %v372_v34, %v371_v28  ;;  %v400_v39 = vrot.slane %v399_v35, 1 }
  0xdd   :  { %945 = vmatpush.bf16.msrb.mxu2 %v924_v17  ;;  %642 = vmatpush.bf16.msrb.mxu0 %v924_v17 }
  0xde   :  { %v379_v42 = vrot.slane %v378_v36, 2  ;;  %v406_v43 = vadd.f32 %v405_v37, %v404_v33  ;;  %v1200_v44 = vmul.f32 0.03125, %v373_v38  ;;  %v401_v45 = vadd.f32 %v400_v39, %v399_v35  ;;  %v419_v33 = vld [vmem:[#allocation7] sm:$0x3] }
  0xdf   :  { %662 = vmatpush.bf16.msrb.mxu1 %v931_v21  ;;  %954 = vmatpush.bf16.msrb.mxu3 %v931_v21 }
  0xe0   :  { %v380_v46 = vadd.f32 %v379_v42, %v378_v36  ;;  %v407_v47 = vrot.slane %v406_v43, 2  ;;  %v411_v48 = vmul.f32 0.03125, %v401_v45  ;;  %v413_v49 = vmul.f32 %v1200_v44, %v1200_v44 }
  0xe1   :  { %946 = vmatpush.bf16.msrb.mxu2 %v923_v20  ;;  %643 = vmatpush.bf16.msrb.mxu0 %v923_v20 }
  0xe2   :  { %v381_v52 = vrot.slane %v380_v46, 1  ;;  %v408_v53 = vadd.f32 %v407_v47, %v406_v43  ;;  %v415_v57 = vsub.f32 %v411_v48, %v413_v49 }
  0xe4   :  { %v382_v58 = vadd.f32 %v381_v52, %v380_v46  ;;  %v409_v59 = vrot.slane %v408_v53, 1  ;;  %v417_v60 = vmax.f32 %v415_v57, 0.0 }
  0xe6   :  { %v1204_v63 = vmul.f32 0.03125, %v382_v58  ;;  %v410_v1 = vadd.f32 %v409_v59, %v408_v53  ;;  %v420_v2 = vadd.f32 1e-05, %v417_v60 }
  0xe8   :  { %v412_v3 = vmul.f32 0.03125, %v410_v1  ;;  %v414_v7 = vmul.f32 %v1204_v63, %v1204_v63  ;;  %967 = vrsqrt.f32 %v420_v2  ;;  %vm428_vm4 = vweird.f32 %v420_v2 }
  0xea   :  { %v416_v10 = vsub.f32 %v412_v3, %v414_v7 }
  0xec   :  { %v418_v11 = vmax.f32 %v416_v10, 0.0 }
  0xee   :  { %v421_v14 = vadd.f32 1e-05, %v418_v11  ;;  %v968_v15 = vpop.eup %967 }
  0xef   :  { %v423_v16 = vmul.f32 %v968_v15, %v420_v2  ;;  %vm429_vm1 = vweird.f32 %v968_v15 }
  0xf0   :  { %969 = vrsqrt.f32 %v421_v14  ;;  %vm438_vm2 = vweird.f32 %v421_v14  ;;  %vm430_vm6 = vmor %vm428_vm4, %vm429_vm1 }
  0xf1   :  { %v424_v19 = vmul.f32 %v968_v15, %v423_v16 }
  0xf3   :  { %v425_v24 = vmul.f32 0.5, %v424_v19  ;;  %v966_v19 = vld [vmem:[%s1235_s5] ss:$0 sm:$0xff] }
  0xf5   :  { %v426_v27 = vsub.f32 1.5, %v425_v24 }
  0xf6   :  { %v970_v23 = vpop.eup %969 }
  0xf7   :  { %v433_v25 = vmul.f32 %v970_v23, %v421_v14  ;;  %vm439_vm0 = vweird.f32 %v970_v23  ;;  %v427_v30 = vmul.f32 %v968_v15, %v426_v27 }
  0xf8   :  { %vm440_vm3 = vmor %vm438_vm2, %vm439_vm0 }
  0xf9   :  { %v434_v26 = vmul.f32 %v970_v23, %v433_v25  ;;  %v431_v35 = vsel %vm430_vm6, %v968_v15, %v427_v30 }
  0xfb   :  { %v435_v28 = vmul.f32 0.5, %v434_v26 }
  0xfd   :  { %v436_v29 = vsub.f32 1.5, %v435_v28 }
  0xff   :  { %v437_v31 = vmul.f32 %v970_v23, %v436_v29 }
 0x101   :  { %v441_v32 = vsel %vm440_vm3, %v970_v23, %v437_v31 }
 0x102   :  { %v444_v34 = vrot.slane %v441_v32, 7 }
 0x104   :  { %v446_v36 = vsel %vm445_vm5, %v431_v35, %v444_v34 }
 0x105   :  { %v448_v37 = vmul.f32 %v446_v36, %v419_v33 }
 0x107   :  { %v451_v38 = vperm.slane %v448_v37, 0  ;;  %v452_v39 = vperm.slane %v448_v37, 1 }
 0x109   :  { %v456_v40 = vmul.f32 %v452_v39, %v1204_v63  ;;  %v455_v42 = vmul.f32 %v451_v38, %v1200_v44  ;;  %v470_v47 = vmul.f32 %v452_v39, %v1195_v22  ;;  %v463_v48 = vmul.f32 %v451_v38, %v1160_v54 }
 0x10a   :  { %v465_v50 = vmul.f32 %v451_v38, %v1162_v55  ;;  %v467_v52 = vmul.f32 %v451_v38, %v1164_v56  ;;  %v469_v53 = vmul.f32 %v451_v38, %v1177_v4  ;;  %v464_v57 = vmul.f32 %v452_v39, %v1179_v5 }
 0x10b   :  { %v459_v43 = vrot.slane %v456_v40, 7  ;;  %v466_v58 = vmul.f32 %v452_v39, %v1174_v0  ;;  %v468_v44 = vmul.f32 %v452_v39, %v1181_v6 }
 0x10d   :  { %v460_v45 = vsel %vm445_vm5, %v455_v42, %v459_v43 }
 0x10e   :  { %v462_v46 = vsub.f32 %v449_v41, %v460_v45 }
 0x110   :  { %v473_v49 = vperm.slane %v462_v46, 1  ;;  %v472_v51 = vperm.slane %v462_v46, 0 }
 0x112   :  { %v483_v59 = vadd.f32 %v473_v49, %v470_v47  ;;  %v476_v60 = vadd.f32 %v472_v51, %v463_v48  ;;  %v478_v61 = vadd.f32 %v472_v51, %v465_v50  ;;  %v480_v22 = vadd.f32 %v472_v51, %v467_v52 }
 0x113   :  { %v482_v62 = vadd.f32 %v472_v51, %v469_v53  ;;  %v477_v54 = vadd.f32 %v473_v49, %v464_v57  ;;  %v479_v63 = vadd.f32 %v473_v49, %v466_v58  ;;  %v481_v1 = vadd.f32 %v473_v49, %v468_v44 }
 0x114   :  { %v484_v55 = vmul.f32 0.1, %v476_v60  ;;  %v486_v2 = vmul.f32 0.1, %v478_v61  ;;  %v488_v3 = vmul.f32 0.1, %v480_v22 }
 0x115   :  { %v490_v56 = vmul.f32 0.1, %v482_v62  ;;  %v485_v7 = vmul.f32 0.1, %v477_v54  ;;  %v487_v4 = vmul.f32 0.1, %v479_v63 }
 0x116   :  { %v492_v8 = vmax.f32 %v476_v60, %v484_v55  ;;  %v494_v5 = vmax.f32 %v478_v61, %v486_v2  ;;  %v496_v9 = vmax.f32 %v480_v22, %v488_v3  ;;  %v489_v0 = vmul.f32 0.1, %v481_v1 }
 0x117   :  { %v498_v10 = vmax.f32 %v482_v62, %v490_v56  ;;  %v493_v6 = vmax.f32 %v477_v54, %v485_v7  ;;  %v495_v11 = vmax.f32 %v479_v63, %v487_v4  ;;  %v491_v12 = vmul.f32 0.1, %v483_v59 }
 0x118   :  { %v500_v13 = vpack.c.bf16 %v494_v5, %v492_v8  ;;  %v497_v14 = vmax.f32 %v481_v1, %v489_v0 }
 0x119   :  { %v502_v15 = vpack.c.bf16 %v498_v10, %v496_v9  ;;  %v501_v16 = vpack.c.bf16 %v495_v11, %v493_v6  ;;  %v499_v17 = vmax.f32 %v483_v59, %v491_v12 }
 0x11a   :  { %644 = vmatmul.bf16.vlgmr.msrb.gmra.mxu0 %v500_v13 }
 0x11b   :  { %649 = vmatmul.bf16.vlgmr.msrb.gmra.mxu2 %v502_v15  ;;  %663 = vmatmul.bf16.vlgmr.msrb.gmra.mxu1 %v501_v16  ;;  %v503_v18 = vpack.c.bf16 %v499_v17, %v497_v14 }
 0x11d   :  { %668 = vmatmul.bf16.vlgmr.msrb.gmra.mxu3 %v503_v18 }
 0x197   :  { %v645_v20 = vpop.f32.mrf.mxu0 }
 0x198   :  { %v646_v21 = vadd.f32 %v966_v19, %v645_v20  ;;  %v664_v23 = vpop.f32.mrf.mxu1 }
 0x19a   :  { %v665_v24 = vadd.f32 %v664_v23, %v646_v21 }
 0x19c   :  { %674 = vst [vmem:[#allocation10] sm:$0xff] %v665_v24 }
 0x19e   :  { %v650_v25 = vpop.f32.mrf.mxu2 }
 0x19f   :  { %v651_v26 = vadd.f32 %v966_v19, %v650_v25  ;;  %v647_v27 = vpop.f32.mrf.mxu0 }
 0x1a0   :  { %v669_v28 = vpop.f32.mrf.mxu3  ;;  %v648_v29 = vadd.f32 %v966_v19, %v647_v27  ;;  %v666_v31 = vpop.f32.mrf.mxu1 }
 0x1a1   :  { %v670_v30 = vadd.f32 %v669_v28, %v651_v26 }
 0x1a2   :  { %v667_v32 = vadd.f32 %v666_v31, %v648_v29 }
 0x1a3   :  { %676 = vst [vmem:[#allocation10 + $0x10] sm:$0xff] %v670_v30 }
 0x1a4   :  { %675 = vst [vmem:[#allocation10 + $0x8] sm:$0xff] %v667_v32 }
 0x1a6   :  { %v652_v33 = vpop.f32.mrf.mxu2 }
 0x1a7   :  { %v653_v34 = vadd.f32 %v966_v19, %v652_v33 }
 0x1a8   :  { %v671_v35 = vpop.f32.mrf.mxu3 }
 0x1a9   :  { %v672_v36 = vadd.f32 %v671_v35, %v653_v34 }
 0x1ab   :  { %677 = vst [vmem:[#allocation10 + $0x18] sm:$0xff] %v672_v36 }
 0x1ac   :  { %690 = dma.vmem_to_hbm [thread:$0]  %s683_s23, 512, %s685_s25, [#allocation4], %s1100_s29, %s1100_s29, %s1101_s30  }
 0x1ad   :  { %1097 = dma.done.wait [#allocation4], 512  }
 0x1ae   :  { %1098 = vsyncadd [#allocation4], 4294966784 }
 0x1af   :  { %695 = vsyncpa [#allocation3], 1 }
 0x1b0   :  { %696 = vsyncpa [#allocation6], 1 }
 0x1b1   :  { %697 = vsyncpa [#allocation9], 1 }
 0x1b2   :  { %698 = vsyncpa [#allocation4], 1 }

</bundles_post_ra>
